<compile_context>
chip_gen: v7x
topology: tpu7x:2x2x1
jax: 0.10.0
libtpu: 0.0.40
codegen_flags: <defaults>
</compile_context>

<pallas_src>
import functools

import jax
import jax.numpy as jnp
from jax.experimental import pallas as pl
from jax.experimental.pallas import tpu as pltpu

# Model hyper-parameters (small, consistent with RealNVP(n_flows, data_dim, n_hidden))
N_FLOWS = 4
DATA_DIM = 8            # must be even
N_HALF = DATA_DIM // 2
N_HIDDEN = 32
BATCH = 8
_LANE = 128


def realnvp_kernel(x_ref,
                   w1_ref, b1_ref,       # [F, H, n_half] bf16,   [F, H, 1] f32
                   w2_ref, b2_ref,       # [F, H, H] bf16,        [F, H, 1] f32
                   wst_ref, bst_ref,     # [F, 2*n_half, H] bf16, [F, 2*n_half, 1] f32
                   out_ref, ldj_ref):
    # Activations are [features, batch]: batch on the lane axis.
    x = x_ref[...]                       # [DATA_DIM, TB] f32
    a = x[:N_HALF, :]
    b = x[N_HALF:, :]
    ldj = jnp.zeros_like(a)

    # Static unroll over flows; per-flow weight slices use static indices.
    for k in range(N_FLOWS):
        h = jnp.maximum(
            jnp.dot(w1_ref[k], a.astype(jnp.bfloat16),
                    preferred_element_type=jnp.float32) + b1_ref[k], 0.0)
        h = jnp.maximum(
            jnp.dot(w2_ref[k], h.astype(jnp.bfloat16),
                    preferred_element_type=jnp.float32) + b2_ref[k], 0.0)
        # Fused s/t head: one MXU matmul produces both heads stacked on sublanes.
        st = jnp.dot(wst_ref[k], h.astype(jnp.bfloat16),
                     preferred_element_type=jnp.float32) + bst_ref[k]
        s = jnp.tanh(st[:N_HALF, :])     # EUP
        t = st[N_HALF:, :]
        b_new = jnp.exp(s) * b + t       # EUP + VPU, kept in f32
        # x = cat([x_b_new, x_a])  =>  next (a, b) = (b_new, a)
        a, b = b_new, a
        ldj = ldj + s

    # Single full 8-sublane, lane-dense, unmasked store of the merged output tile.
    out_ref[...] = jnp.concatenate([a, b], axis=0)
    ldj_ref[...] = ldj


@functools.partial(jax.jit, static_argnames=("tile_b",))
def realnvp_forward(x, params, tile_b=8192):
    """x: [B, DATA_DIM] f32 -> (x_out [B, DATA_DIM], log_det_jacobian [B, N_HALF])."""
    W1, B1, W2, B2, WST, BST = params
    if tile_b % _LANE != 0 or tile_b < _LANE:
        raise ValueError("tile_b must be a positive multiple of 128")
    B = x.shape[0]

    # Batch is the lane axis inside the kernel: pad it to a lane-aligned tile.
    b_pad128 = ((B + _LANE - 1) // _LANE) * _LANE
    tb = min(tile_b, b_pad128)
    # v7x megacore: force >= 2 grid steps (2 TensorCores) whenever the batch allows it.
    if b_pad128 // tb < 2 and b_pad128 >= 2 * _LANE:
        tb = ((b_pad128 // 2 + _LANE - 1) // _LANE) * _LANE
    b_pad = ((b_pad128 + tb - 1) // tb) * tb
    grid = (b_pad // tb,)

    # Single pad of the transposed activations (no zeros().at[].set() HBM pass).
    xt = jnp.pad(x.T.astype(jnp.float32), ((0, 0), (0, b_pad - B)))

    # bf16 weights for the MXU; biases stay f32 column vectors [out, 1].
    w1 = W1.astype(jnp.bfloat16)
    w2 = W2.astype(jnp.bfloat16)
    wst = WST.astype(jnp.bfloat16)

    act_spec = pl.BlockSpec((DATA_DIM, tb), lambda i: (0, i))
    ldj_spec = pl.BlockSpec((N_HALF, tb), lambda i: (0, i))
    w_spec = lambda arr: pl.BlockSpec(arr.shape, lambda i: (0, 0, 0))  # grid-invariant

    # Rough per-step VMEM: double-buffered I/O blocks + live f32 intermediates (bytes/lane).
    per_lane_bytes = 4 * (2 * (2 * DATA_DIM + N_HALF)           # 2x-buffered in/out/ldj
                          + 2 * N_HIDDEN + 2 * DATA_DIM + 4 * N_HALF)  # h, st, a/b/s/t
    vmem_limit = int(min(100 * 2**20, max(32 * 2**20, 2 * per_lane_bytes * tb)))

    flops = 2 * N_FLOWS * (N_HIDDEN * N_HALF + N_HIDDEN * N_HIDDEN
                           + 2 * N_HALF * N_HIDDEN) * b_pad
    transcendentals = 2 * N_FLOWS * N_HALF * b_pad
    weight_bytes = sum(int(a.size) * a.dtype.itemsize
                       for a in (w1, B1, w2, B2, wst, BST))
    bytes_accessed = (2 * DATA_DIM + N_HALF) * 4 * b_pad + weight_bytes

    out, ldj = pl.pallas_call(
        realnvp_kernel,
        out_shape=(jax.ShapeDtypeStruct((DATA_DIM, b_pad), jnp.float32),
                   jax.ShapeDtypeStruct((N_HALF, b_pad), jnp.float32)),
        grid=grid,
        in_specs=[act_spec,
                  w_spec(w1), w_spec(B1), w_spec(w2), w_spec(B2),
                  w_spec(wst), w_spec(BST)],
        out_specs=(act_spec, ldj_spec),
        compiler_params=pltpu.CompilerParams(
            dimension_semantics=("parallel",),
            vmem_limit_bytes=vmem_limit),
        cost_estimate=pl.CostEstimate(flops=flops,
                                      transcendentals=transcendentals,
                                      bytes_accessed=bytes_accessed),
    )(xt, w1, B1, w2, B2, wst, BST)

    # Strip batch padding / transpose back in the wrapper (layout plumbing only).
    x_out = out[:, :B].T
    log_det_jacobian = ldj[:, :B].T
    return x_out, log_det_jacobian


def init_params(key):
    """Deterministic per-flow MLP params, PyTorch-Linear layout W:[out,in], b:[out,1]."""
    def linear(k, n_in, n_out):
        k1, k2 = jax.random.split(k)
        bound = 1.0 / (n_in ** 0.5)
        w = jax.random.uniform(k1, (n_out, n_in), jnp.float32, -bound, bound)
        b = jax.random.uniform(k2, (n_out, 1), jnp.float32, -bound, bound)
        return w, b

    keys = jax.random.split(key, N_FLOWS * 4)
    W1, B1, W2, B2, WST, BST = ([] for _ in range(6))
    for k in range(N_FLOWS):
        w1, b1 = linear(keys[4 * k + 0], N_HALF, N_HIDDEN)
        w2, b2 = linear(keys[4 * k + 1], N_HIDDEN, N_HIDDEN)
        ws, bs = linear(keys[4 * k + 2], N_HIDDEN, N_HALF)
        wt, bt = linear(keys[4 * k + 3], N_HIDDEN, N_HALF)
        W1.append(w1); B1.append(b1); W2.append(w2); B2.append(b2)
        # Fused s/t head: rows [0:n_half] = fc3_s, rows [n_half:2*n_half] = fc3_t.
        WST.append(jnp.concatenate([ws, wt], axis=0))
        BST.append(jnp.concatenate([bs, bt], axis=0))

    stack = lambda xs: jnp.stack(xs, axis=0)
    return (stack(W1), stack(B1), stack(W2), stack(B2), stack(WST), stack(BST))


def realnvp_reference(x, params):
    """Pure-JAX f32 reference mirroring the PyTorch forward exactly."""
    W1, B1, W2, B2, WST, BST = params
    ldj = jnp.zeros((x.shape[0], N_HALF), jnp.float32)
    for k in range(N_FLOWS):
        x_a = x[:, :N_HALF]
        x_b = x[:, N_HALF:]
        h = jax.nn.relu(x_a @ W1[k].T + B1[k][:, 0])
        h = jax.nn.relu(h @ W2[k].T + B2[k][:, 0])
        ws, wt = WST[k][:N_HALF], WST[k][N_HALF:]
        bs, bt = BST[k][:N_HALF, 0], BST[k][N_HALF:, 0]
        s = jnp.tanh(h @ ws.T + bs)
        t = h @ wt.T + bt
        x_b = jnp.exp(s) * x_b + t
        x = jnp.concatenate([x_b, x_a], axis=1)
        ldj = ldj + s
    return x, ldj


if __name__ == "__main__":
    key = jax.random.PRNGKey(0)
    kx, kp = jax.random.split(key)
    x = jax.random.normal(kx, (BATCH, DATA_DIM), jnp.float32)
    params = init_params(kp)

    out, ldj = realnvp_forward(x, params)
    out = jax.block_until_ready(out)
    ldj = jax.block_until_ready(ldj)

    ref_out, ref_ldj = realnvp_reference(x, params)
    # bf16 MXU operands -> loosened tolerance vs the pure-f32 reference.
    assert jnp.allclose(out, ref_out, atol=5e-2, rtol=5e-2), "output mismatch"
    assert jnp.allclose(ldj, ref_ldj, atol=5e-2, rtol=5e-2), "log-det mismatch"

    print("KERNEL_OK")
</pallas_src>

<mosaic_0001>
module attributes {stable_mosaic.version = 11 : i64} {
  func.func @realnvp_kernel(%arg0: i32, %arg1: memref<8x128xf32, #tpu.memory_space<vmem>>, %arg2: memref<4x32x4xbf16, #tpu.memory_space<vmem>>, %arg3: memref<4x32x1xf32, #tpu.memory_space<vmem>>, %arg4: memref<4x32x32xbf16, #tpu.memory_space<vmem>>, %arg5: memref<4x32x1xf32, #tpu.memory_space<vmem>>, %arg6: memref<4x8x32xbf16, #tpu.memory_space<vmem>>, %arg7: memref<4x8x1xf32, #tpu.memory_space<vmem>>, %arg8: memref<8x128xf32, #tpu.memory_space<vmem>>, %arg9: memref<4x128xf32, #tpu.memory_space<vmem>>) attributes {dimension_semantics = [#tpu.dimension_semantics<parallel>], iteration_bounds = array<i64: 1>, scalar_prefetch = 0 : i64, scratch_operands = 0 : i64, tpu.core_type = #tpu.core_type<tc>, window_params = [{transform_indices = @transform_0, window_bounds = array<i64: 8, 128>}, {pipeline_mode = #tpu.pipeline_mode<synchronous>, transform_indices = @transform_1, window_bounds = array<i64: 4, 32, 4>}, {pipeline_mode = #tpu.pipeline_mode<synchronous>, transform_indices = @transform_2, window_bounds = array<i64: 4, 32, 1>}, {pipeline_mode = #tpu.pipeline_mode<synchronous>, transform_indices = @transform_3, window_bounds = array<i64: 4, 32, 32>}, {pipeline_mode = #tpu.pipeline_mode<synchronous>, transform_indices = @transform_4, window_bounds = array<i64: 4, 32, 1>}, {pipeline_mode = #tpu.pipeline_mode<synchronous>, transform_indices = @transform_5, window_bounds = array<i64: 4, 8, 32>}, {pipeline_mode = #tpu.pipeline_mode<synchronous>, transform_indices = @transform_6, window_bounds = array<i64: 4, 8, 1>}, {transform_indices = @transform_7, window_bounds = array<i64: 8, 128>}, {transform_indices = @transform_8, window_bounds = array<i64: 4, 128>}]} {
    %c0 = arith.constant 0 : index
    %c0_0 = arith.constant 0 : index
    %0 = vector.load %arg1[%c0, %c0_0] : memref<8x128xf32, #tpu.memory_space<vmem>>, vector<8x128xf32>
    %1 = vector.extract_strided_slice %0 {offsets = [0, 0], sizes = [4, 128], strides = [1, 1]} : vector<8x128xf32> to vector<4x128xf32>
    %2 = vector.extract_strided_slice %0 {offsets = [4, 0], sizes = [4, 128], strides = [1, 1]} : vector<8x128xf32> to vector<4x128xf32>
    %cst = arith.constant 0.000000e+00 : f32
    %3 = vector.broadcast %cst : f32 to vector<4x128xf32>
    %c0_1 = arith.constant 0 : index
    %c0_2 = arith.constant 0 : index
    %c0_3 = arith.constant 0 : index
    %4 = vector.load %arg2[%c0_1, %c0_2, %c0_3] : memref<4x32x4xbf16, #tpu.memory_space<vmem>>, vector<1x32x4xbf16>
    %5 = vector.shape_cast %4 : vector<1x32x4xbf16> to vector<32x4xbf16>
    %6 = arith.truncf %1 : vector<4x128xf32> to vector<4x128xbf16>
    %cst_4 = arith.constant dense<0.000000e+00> : vector<32x128xf32>
    %7 = tpu.matmul %5, %6, %cst_4 {dimension_numbers = #tpu.dot_dimension_numbers<[1], [0], [0], [1], [0, 0, 1, 1], [], []>} : vector<32x4xbf16>, vector<4x128xbf16>, vector<32x128xf32> -> vector<32x128xf32>
    %c0_5 = arith.constant 0 : index
    %c0_6 = arith.constant 0 : index
    %c0_7 = arith.constant 0 : index
    %8 = vector.load %arg3[%c0_5, %c0_6, %c0_7] : memref<4x32x1xf32, #tpu.memory_space<vmem>>, vector<1x32x1xf32>
    %9 = vector.shape_cast %8 : vector<1x32x1xf32> to vector<32x1xf32>
    %10 = vector.broadcast %9 : vector<32x1xf32> to vector<32x128xf32>
    %11 = arith.addf %7, %10 : vector<32x128xf32>
    %cst_8 = arith.constant 0.000000e+00 : f32
    %12 = vector.broadcast %cst_8 : f32 to vector<32x128xf32>
    %13 = arith.maximumf %11, %12 : vector<32x128xf32>
    %c0_9 = arith.constant 0 : index
    %c0_10 = arith.constant 0 : index
    %c0_11 = arith.constant 0 : index
    %14 = vector.load %arg4[%c0_9, %c0_10, %c0_11] : memref<4x32x32xbf16, #tpu.memory_space<vmem>>, vector<1x32x32xbf16>
    %15 = vector.shape_cast %14 : vector<1x32x32xbf16> to vector<32x32xbf16>
    %16 = arith.truncf %13 : vector<32x128xf32> to vector<32x128xbf16>
    %cst_12 = arith.constant dense<0.000000e+00> : vector<32x128xf32>
    %17 = tpu.matmul %15, %16, %cst_12 {dimension_numbers = #tpu.dot_dimension_numbers<[1], [0], [0], [1], [0, 0, 1, 1], [], []>} : vector<32x32xbf16>, vector<32x128xbf16>, vector<32x128xf32> -> vector<32x128xf32>
    %c0_13 = arith.constant 0 : index
    %c0_14 = arith.constant 0 : index
    %c0_15 = arith.constant 0 : index
    %18 = vector.load %arg5[%c0_13, %c0_14, %c0_15] : memref<4x32x1xf32, #tpu.memory_space<vmem>>, vector<1x32x1xf32>
    %19 = vector.shape_cast %18 : vector<1x32x1xf32> to vector<32x1xf32>
    %20 = vector.broadcast %19 : vector<32x1xf32> to vector<32x128xf32>
    %21 = arith.addf %17, %20 : vector<32x128xf32>
    %cst_16 = arith.constant 0.000000e+00 : f32
    %22 = vector.broadcast %cst_16 : f32 to vector<32x128xf32>
    %23 = arith.maximumf %21, %22 : vector<32x128xf32>
    %c0_17 = arith.constant 0 : index
    %c0_18 = arith.constant 0 : index
    %c0_19 = arith.constant 0 : index
    %24 = vector.load %arg6[%c0_17, %c0_18, %c0_19] : memref<4x8x32xbf16, #tpu.memory_space<vmem>>, vector<1x8x32xbf16>
    %25 = vector.shape_cast %24 : vector<1x8x32xbf16> to vector<8x32xbf16>
    %26 = arith.truncf %23 : vector<32x128xf32> to vector<32x128xbf16>
    %cst_20 = arith.constant dense<0.000000e+00> : vector<8x128xf32>
    %27 = tpu.matmul %25, %26, %cst_20 {dimension_numbers = #tpu.dot_dimension_numbers<[1], [0], [0], [1], [0, 0, 1, 1], [], []>} : vector<8x32xbf16>, vector<32x128xbf16>, vector<8x128xf32> -> vector<8x128xf32>
    %c0_21 = arith.constant 0 : index
    %c0_22 = arith.constant 0 : index
    %c0_23 = arith.constant 0 : index
    %28 = vector.load %arg7[%c0_21, %c0_22, %c0_23] : memref<4x8x1xf32, #tpu.memory_space<vmem>>, vector<1x8x1xf32>
    %29 = vector.shape_cast %28 : vector<1x8x1xf32> to vector<8x1xf32>
    %30 = vector.broadcast %29 : vector<8x1xf32> to vector<8x128xf32>
    %31 = arith.addf %27, %30 : vector<8x128xf32>
    %32 = vector.extract_strided_slice %31 {offsets = [0, 0], sizes = [4, 128], strides = [1, 1]} : vector<8x128xf32> to vector<4x128xf32>
    %33 = math.tanh %32 : vector<4x128xf32>
    %34 = vector.extract_strided_slice %31 {offsets = [4, 0], sizes = [4, 128], strides = [1, 1]} : vector<8x128xf32> to vector<4x128xf32>
    %35 = math.exp %33 : vector<4x128xf32>
    %36 = arith.mulf %35, %2 : vector<4x128xf32>
    %37 = arith.addf %36, %34 : vector<4x128xf32>
    %38 = arith.addf %3, %33 : vector<4x128xf32>
    %c1 = arith.constant 1 : index
    %c0_24 = arith.constant 0 : index
    %c0_25 = arith.constant 0 : index
    %39 = vector.load %arg2[%c1, %c0_24, %c0_25] : memref<4x32x4xbf16, #tpu.memory_space<vmem>>, vector<1x32x4xbf16>
    %40 = vector.shape_cast %39 : vector<1x32x4xbf16> to vector<32x4xbf16>
    %41 = arith.truncf %37 : vector<4x128xf32> to vector<4x128xbf16>
    %cst_26 = arith.constant dense<0.000000e+00> : vector<32x128xf32>
    %42 = tpu.matmul %40, %41, %cst_26 {dimension_numbers = #tpu.dot_dimension_numbers<[1], [0], [0], [1], [0, 0, 1, 1], [], []>} : vector<32x4xbf16>, vector<4x128xbf16>, vector<32x128xf32> -> vector<32x128xf32>
    %c1_27 = arith.constant 1 : index
    %c0_28 = arith.constant 0 : index
    %c0_29 = arith.constant 0 : index
    %43 = vector.load %arg3[%c1_27, %c0_28, %c0_29] : memref<4x32x1xf32, #tpu.memory_space<vmem>>, vector<1x32x1xf32>
    %44 = vector.shape_cast %43 : vector<1x32x1xf32> to vector<32x1xf32>
    %45 = vector.broadcast %44 : vector<32x1xf32> to vector<32x128xf32>
    %46 = arith.addf %42, %45 : vector<32x128xf32>
    %cst_30 = arith.constant 0.000000e+00 : f32
    %47 = vector.broadcast %cst_30 : f32 to vector<32x128xf32>
    %48 = arith.maximumf %46, %47 : vector<32x128xf32>
    %c1_31 = arith.constant 1 : index
    %c0_32 = arith.constant 0 : index
    %c0_33 = arith.constant 0 : index
    %49 = vector.load %arg4[%c1_31, %c0_32, %c0_33] : memref<4x32x32xbf16, #tpu.memory_space<vmem>>, vector<1x32x32xbf16>
    %50 = vector.shape_cast %49 : vector<1x32x32xbf16> to vector<32x32xbf16>
    %51 = arith.truncf %48 : vector<32x128xf32> to vector<32x128xbf16>
    %cst_34 = arith.constant dense<0.000000e+00> : vector<32x128xf32>
    %52 = tpu.matmul %50, %51, %cst_34 {dimension_numbers = #tpu.dot_dimension_numbers<[1], [0], [0], [1], [0, 0, 1, 1], [], []>} : vector<32x32xbf16>, vector<32x128xbf16>, vector<32x128xf32> -> vector<32x128xf32>
    %c1_35 = arith.constant 1 : index
    %c0_36 = arith.constant 0 : index
    %c0_37 = arith.constant 0 : index
    %53 = vector.load %arg5[%c1_35, %c0_36, %c0_37] : memref<4x32x1xf32, #tpu.memory_space<vmem>>, vector<1x32x1xf32>
    %54 = vector.shape_cast %53 : vector<1x32x1xf32> to vector<32x1xf32>
    %55 = vector.broadcast %54 : vector<32x1xf32> to vector<32x128xf32>
    %56 = arith.addf %52, %55 : vector<32x128xf32>
    %cst_38 = arith.constant 0.000000e+00 : f32
    %57 = vector.broadcast %cst_38 : f32 to vector<32x128xf32>
    %58 = arith.maximumf %56, %57 : vector<32x128xf32>
    %c1_39 = arith.constant 1 : index
    %c0_40 = arith.constant 0 : index
    %c0_41 = arith.constant 0 : index
    %59 = vector.load %arg6[%c1_39, %c0_40, %c0_41] : memref<4x8x32xbf16, #tpu.memory_space<vmem>>, vector<1x8x32xbf16>
    %60 = vector.shape_cast %59 : vector<1x8x32xbf16> to vector<8x32xbf16>
    %61 = arith.truncf %58 : vector<32x128xf32> to vector<32x128xbf16>
    %cst_42 = arith.constant dense<0.000000e+00> : vector<8x128xf32>
    %62 = tpu.matmul %60, %61, %cst_42 {dimension_numbers = #tpu.dot_dimension_numbers<[1], [0], [0], [1], [0, 0, 1, 1], [], []>} : vector<8x32xbf16>, vector<32x128xbf16>, vector<8x128xf32> -> vector<8x128xf32>
    %c1_43 = arith.constant 1 : index
    %c0_44 = arith.constant 0 : index
    %c0_45 = arith.constant 0 : index
    %63 = vector.load %arg7[%c1_43, %c0_44, %c0_45] : memref<4x8x1xf32, #tpu.memory_space<vmem>>, vector<1x8x1xf32>
    %64 = vector.shape_cast %63 : vector<1x8x1xf32> to vector<8x1xf32>
    %65 = vector.broadcast %64 : vector<8x1xf32> to vector<8x128xf32>
    %66 = arith.addf %62, %65 : vector<8x128xf32>
    %67 = vector.extract_strided_slice %66 {offsets = [0, 0], sizes = [4, 128], strides = [1, 1]} : vector<8x128xf32> to vector<4x128xf32>
    %68 = math.tanh %67 : vector<4x128xf32>
    %69 = vector.extract_strided_slice %66 {offsets = [4, 0], sizes = [4, 128], strides = [1, 1]} : vector<8x128xf32> to vector<4x128xf32>
    %70 = math.exp %68 : vector<4x128xf32>
    %71 = arith.mulf %70, %1 : vector<4x128xf32>
    %72 = arith.addf %71, %69 : vector<4x128xf32>
    %73 = arith.addf %38, %68 : vector<4x128xf32>
    %c2 = arith.constant 2 : index
    %c0_46 = arith.constant 0 : index
    %c0_47 = arith.constant 0 : index
    %74 = vector.load %arg2[%c2, %c0_46, %c0_47] : memref<4x32x4xbf16, #tpu.memory_space<vmem>>, vector<1x32x4xbf16>
    %75 = vector.shape_cast %74 : vector<1x32x4xbf16> to vector<32x4xbf16>
    %76 = arith.truncf %72 : vector<4x128xf32> to vector<4x128xbf16>
    %cst_48 = arith.constant dense<0.000000e+00> : vector<32x128xf32>
    %77 = tpu.matmul %75, %76, %cst_48 {dimension_numbers = #tpu.dot_dimension_numbers<[1], [0], [0], [1], [0, 0, 1, 1], [], []>} : vector<32x4xbf16>, vector<4x128xbf16>, vector<32x128xf32> -> vector<32x128xf32>
    %c2_49 = arith.constant 2 : index
    %c0_50 = arith.constant 0 : index
    %c0_51 = arith.constant 0 : index
    %78 = vector.load %arg3[%c2_49, %c0_50, %c0_51] : memref<4x32x1xf32, #tpu.memory_space<vmem>>, vector<1x32x1xf32>
    %79 = vector.shape_cast %78 : vector<1x32x1xf32> to vector<32x1xf32>
    %80 = vector.broadcast %79 : vector<32x1xf32> to vector<32x128xf32>
    %81 = arith.addf %77, %80 : vector<32x128xf32>
    %cst_52 = arith.constant 0.000000e+00 : f32
    %82 = vector.broadcast %cst_52 : f32 to vector<32x128xf32>
    %83 = arith.maximumf %81, %82 : vector<32x128xf32>
    %c2_53 = arith.constant 2 : index
    %c0_54 = arith.constant 0 : index
    %c0_55 = arith.constant 0 : index
    %84 = vector.load %arg4[%c2_53, %c0_54, %c0_55] : memref<4x32x32xbf16, #tpu.memory_space<vmem>>, vector<1x32x32xbf16>
    %85 = vector.shape_cast %84 : vector<1x32x32xbf16> to vector<32x32xbf16>
    %86 = arith.truncf %83 : vector<32x128xf32> to vector<32x128xbf16>
    %cst_56 = arith.constant dense<0.000000e+00> : vector<32x128xf32>
    %87 = tpu.matmul %85, %86, %cst_56 {dimension_numbers = #tpu.dot_dimension_numbers<[1], [0], [0], [1], [0, 0, 1, 1], [], []>} : vector<32x32xbf16>, vector<32x128xbf16>, vector<32x128xf32> -> vector<32x128xf32>
    %c2_57 = arith.constant 2 : index
    %c0_58 = arith.constant 0 : index
    %c0_59 = arith.constant 0 : index
    %88 = vector.load %arg5[%c2_57, %c0_58, %c0_59] : memref<4x32x1xf32, #tpu.memory_space<vmem>>, vector<1x32x1xf32>
    %89 = vector.shape_cast %88 : vector<1x32x1xf32> to vector<32x1xf32>
    %90 = vector.broadcast %89 : vector<32x1xf32> to vector<32x128xf32>
    %91 = arith.addf %87, %90 : vector<32x128xf32>
    %cst_60 = arith.constant 0.000000e+00 : f32
    %92 = vector.broadcast %cst_60 : f32 to vector<32x128xf32>
    %93 = arith.maximumf %91, %92 : vector<32x128xf32>
    %c2_61 = arith.constant 2 : index
    %c0_62 = arith.constant 0 : index
    %c0_63 = arith.constant 0 : index
    %94 = vector.load %arg6[%c2_61, %c0_62, %c0_63] : memref<4x8x32xbf16, #tpu.memory_space<vmem>>, vector<1x8x32xbf16>
    %95 = vector.shape_cast %94 : vector<1x8x32xbf16> to vector<8x32xbf16>
    %96 = arith.truncf %93 : vector<32x128xf32> to vector<32x128xbf16>
    %cst_64 = arith.constant dense<0.000000e+00> : vector<8x128xf32>
    %97 = tpu.matmul %95, %96, %cst_64 {dimension_numbers = #tpu.dot_dimension_numbers<[1], [0], [0], [1], [0, 0, 1, 1], [], []>} : vector<8x32xbf16>, vector<32x128xbf16>, vector<8x128xf32> -> vector<8x128xf32>
    %c2_65 = arith.constant 2 : index
    %c0_66 = arith.constant 0 : index
    %c0_67 = arith.constant 0 : index
    %98 = vector.load %arg7[%c2_65, %c0_66, %c0_67] : memref<4x8x1xf32, #tpu.memory_space<vmem>>, vector<1x8x1xf32>
    %99 = vector.shape_cast %98 : vector<1x8x1xf32> to vector<8x1xf32>
    %100 = vector.broadcast %99 : vector<8x1xf32> to vector<8x128xf32>
    %101 = arith.addf %97, %100 : vector<8x128xf32>
    %102 = vector.extract_strided_slice %101 {offsets = [0, 0], sizes = [4, 128], strides = [1, 1]} : vector<8x128xf32> to vector<4x128xf32>
    %103 = math.tanh %102 : vector<4x128xf32>
    %104 = vector.extract_strided_slice %101 {offsets = [4, 0], sizes = [4, 128], strides = [1, 1]} : vector<8x128xf32> to vector<4x128xf32>
    %105 = math.exp %103 : vector<4x128xf32>
    %106 = arith.mulf %105, %37 : vector<4x128xf32>
    %107 = arith.addf %106, %104 : vector<4x128xf32>
    %108 = arith.addf %73, %103 : vector<4x128xf32>
    %c3 = arith.constant 3 : index
    %c0_68 = arith.constant 0 : index
    %c0_69 = arith.constant 0 : index
    %109 = vector.load %arg2[%c3, %c0_68, %c0_69] : memref<4x32x4xbf16, #tpu.memory_space<vmem>>, vector<1x32x4xbf16>
    %110 = vector.shape_cast %109 : vector<1x32x4xbf16> to vector<32x4xbf16>
    %111 = arith.truncf %107 : vector<4x128xf32> to vector<4x128xbf16>
    %cst_70 = arith.constant dense<0.000000e+00> : vector<32x128xf32>
    %112 = tpu.matmul %110, %111, %cst_70 {dimension_numbers = #tpu.dot_dimension_numbers<[1], [0], [0], [1], [0, 0, 1, 1], [], []>} : vector<32x4xbf16>, vector<4x128xbf16>, vector<32x128xf32> -> vector<32x128xf32>
    %c3_71 = arith.constant 3 : index
    %c0_72 = arith.constant 0 : index
    %c0_73 = arith.constant 0 : index
    %113 = vector.load %arg3[%c3_71, %c0_72, %c0_73] : memref<4x32x1xf32, #tpu.memory_space<vmem>>, vector<1x32x1xf32>
    %114 = vector.shape_cast %113 : vector<1x32x1xf32> to vector<32x1xf32>
    %115 = vector.broadcast %114 : vector<32x1xf32> to vector<32x128xf32>
    %116 = arith.addf %112, %115 : vector<32x128xf32>
    %cst_74 = arith.constant 0.000000e+00 : f32
    %117 = vector.broadcast %cst_74 : f32 to vector<32x128xf32>
    %118 = arith.maximumf %116, %117 : vector<32x128xf32>
    %c3_75 = arith.constant 3 : index
    %c0_76 = arith.constant 0 : index
    %c0_77 = arith.constant 0 : index
    %119 = vector.load %arg4[%c3_75, %c0_76, %c0_77] : memref<4x32x32xbf16, #tpu.memory_space<vmem>>, vector<1x32x32xbf16>
    %120 = vector.shape_cast %119 : vector<1x32x32xbf16> to vector<32x32xbf16>
    %121 = arith.truncf %118 : vector<32x128xf32> to vector<32x128xbf16>
    %cst_78 = arith.constant dense<0.000000e+00> : vector<32x128xf32>
    %122 = tpu.matmul %120, %121, %cst_78 {dimension_numbers = #tpu.dot_dimension_numbers<[1], [0], [0], [1], [0, 0, 1, 1], [], []>} : vector<32x32xbf16>, vector<32x128xbf16>, vector<32x128xf32> -> vector<32x128xf32>
    %c3_79 = arith.constant 3 : index
    %c0_80 = arith.constant 0 : index
    %c0_81 = arith.constant 0 : index
    %123 = vector.load %arg5[%c3_79, %c0_80, %c0_81] : memref<4x32x1xf32, #tpu.memory_space<vmem>>, vector<1x32x1xf32>
    %124 = vector.shape_cast %123 : vector<1x32x1xf32> to vector<32x1xf32>
    %125 = vector.broadcast %124 : vector<32x1xf32> to vector<32x128xf32>
    %126 = arith.addf %122, %125 : vector<32x128xf32>
    %cst_82 = arith.constant 0.000000e+00 : f32
    %127 = vector.broadcast %cst_82 : f32 to vector<32x128xf32>
    %128 = arith.maximumf %126, %127 : vector<32x128xf32>
    %c3_83 = arith.constant 3 : index
    %c0_84 = arith.constant 0 : index
    %c0_85 = arith.constant 0 : index
    %129 = vector.load %arg6[%c3_83, %c0_84, %c0_85] : memref<4x8x32xbf16, #tpu.memory_space<vmem>>, vector<1x8x32xbf16>
    %130 = vector.shape_cast %129 : vector<1x8x32xbf16> to vector<8x32xbf16>
    %131 = arith.truncf %128 : vector<32x128xf32> to vector<32x128xbf16>
    %cst_86 = arith.constant dense<0.000000e+00> : vector<8x128xf32>
    %132 = tpu.matmul %130, %131, %cst_86 {dimension_numbers = #tpu.dot_dimension_numbers<[1], [0], [0], [1], [0, 0, 1, 1], [], []>} : vector<8x32xbf16>, vector<32x128xbf16>, vector<8x128xf32> -> vector<8x128xf32>
    %c3_87 = arith.constant 3 : index
    %c0_88 = arith.constant 0 : index
    %c0_89 = arith.constant 0 : index
    %133 = vector.load %arg7[%c3_87, %c0_88, %c0_89] : memref<4x8x1xf32, #tpu.memory_space<vmem>>, vector<1x8x1xf32>
    %134 = vector.shape_cast %133 : vector<1x8x1xf32> to vector<8x1xf32>
    %135 = vector.broadcast %134 : vector<8x1xf32> to vector<8x128xf32>
    %136 = arith.addf %132, %135 : vector<8x128xf32>
    %137 = vector.extract_strided_slice %136 {offsets = [0, 0], sizes = [4, 128], strides = [1, 1]} : vector<8x128xf32> to vector<4x128xf32>
    %138 = math.tanh %137 : vector<4x128xf32>
    %139 = vector.extract_strided_slice %136 {offsets = [4, 0], sizes = [4, 128], strides = [1, 1]} : vector<8x128xf32> to vector<4x128xf32>
    %140 = math.exp %138 : vector<4x128xf32>
    %141 = arith.mulf %140, %72 : vector<4x128xf32>
    %142 = arith.addf %141, %139 : vector<4x128xf32>
    %143 = arith.addf %108, %138 : vector<4x128xf32>
    %144 = tpu.concatenate %142, %107 in 0 : vector<4x128xf32>, vector<4x128xf32> -> vector<8x128xf32>
    %c0_90 = arith.constant 0 : index
    %c0_91 = arith.constant 0 : index
    %145 = vector.load %arg8[%c0_90, %c0_91] : memref<8x128xf32, #tpu.memory_space<vmem>>, vector<8x128xf32>
    tpu.vector_store %arg8[%c0_90, %c0_91], %144 {strides = array<i32>} : memref<8x128xf32, #tpu.memory_space<vmem>>, vector<8x128xf32>,
    %c0_92 = arith.constant 0 : index
    %c0_93 = arith.constant 0 : index
    %146 = vector.load %arg9[%c0_92, %c0_93] : memref<4x128xf32, #tpu.memory_space<vmem>>, vector<4x128xf32>
    tpu.vector_store %arg9[%c0_92, %c0_93], %143 {strides = array<i32>} : memref<4x128xf32, #tpu.memory_space<vmem>>, vector<4x128xf32>,
    return
  }
  func.func @transform_0(%arg0: i32) -> (i32, i32) {
    %c0_i32 = arith.constant 0 : i32
    %c0_i32_0 = arith.constant 0 : i32
    return %c0_i32, %arg0 : i32, i32
  }
  func.func @transform_1(%arg0: i32) -> (i32, i32, i32) {
    %c0_i32 = arith.constant 0 : i32
    %c0_i32_0 = arith.constant 0 : i32
    %c0_i32_1 = arith.constant 0 : i32
    %c0_i32_2 = arith.constant 0 : i32
    return %c0_i32, %c0_i32_0, %c0_i32_1 : i32, i32, i32
  }
  func.func @transform_2(%arg0: i32) -> (i32, i32, i32) {
    %c0_i32 = arith.constant 0 : i32
    %c0_i32_0 = arith.constant 0 : i32
    %c0_i32_1 = arith.constant 0 : i32
    %c0_i32_2 = arith.constant 0 : i32
    return %c0_i32, %c0_i32_0, %c0_i32_1 : i32, i32, i32
  }
  func.func @transform_3(%arg0: i32) -> (i32, i32, i32) {
    %c0_i32 = arith.constant 0 : i32
    %c0_i32_0 = arith.constant 0 : i32
    %c0_i32_1 = arith.constant 0 : i32
    %c0_i32_2 = arith.constant 0 : i32
    return %c0_i32, %c0_i32_0, %c0_i32_1 : i32, i32, i32
  }
  func.func @transform_4(%arg0: i32) -> (i32, i32, i32) {
    %c0_i32 = arith.constant 0 : i32
    %c0_i32_0 = arith.constant 0 : i32
    %c0_i32_1 = arith.constant 0 : i32
    %c0_i32_2 = arith.constant 0 : i32
    return %c0_i32, %c0_i32_0, %c0_i32_1 : i32, i32, i32
  }
  func.func @transform_5(%arg0: i32) -> (i32, i32, i32) {
    %c0_i32 = arith.constant 0 : i32
    %c0_i32_0 = arith.constant 0 : i32
    %c0_i32_1 = arith.constant 0 : i32
    %c0_i32_2 = arith.constant 0 : i32
    return %c0_i32, %c0_i32_0, %c0_i32_1 : i32, i32, i32
  }
  func.func @transform_6(%arg0: i32) -> (i32, i32, i32) {
    %c0_i32 = arith.constant 0 : i32
    %c0_i32_0 = arith.constant 0 : i32
    %c0_i32_1 = arith.constant 0 : i32
    %c0_i32_2 = arith.constant 0 : i32
    return %c0_i32, %c0_i32_0, %c0_i32_1 : i32, i32, i32
  }
  func.func @transform_7(%arg0: i32) -> (i32, i32) {
    %c0_i32 = arith.constant 0 : i32
    %c0_i32_0 = arith.constant 0 : i32
    return %c0_i32, %arg0 : i32, i32
  }
  func.func @transform_8(%arg0: i32) -> (i32, i32) {
    %c0_i32 = arith.constant 0 : i32
    %c0_i32_0 = arith.constant 0 : i32
    return %c0_i32, %arg0 : i32, i32
  }
}

</mosaic_0001>

<bundles_post_ra>
// kernel: realnvp_forward.1
= control target key start
LH: loop header
LB: loop body
LE: loop exit
PB: predicated region body
PF: predicated region fallthrough
CT: control target
= control target key end

     0   :  { %vm76_vm0 = vcmask 1041408   ;;  %vm69_vm1 = vcmask 31744   ;;  %v1372_v1 = vmov 0   ;;  %vm173_vm2 = vcmask 261120   ;;  %s1673_s0 = inlined_call_operand.vmem [shape: f32[8,128], index: 0, kind: input, shape index: {}]   ;;  %s1674_s1 = inlined_call_operand.vmem [shape: bf16[4,32,4], index: 1, kind: input, shape index: {}]   ;;  %s1675_s2 = inlined_call_operand.vmem [shape: f32[4,32,1], index: 2, kind: input, shape index: {}]   ;;  %s1676_s4 = inlined_call_operand.vmem [shape: f32[4,32,1], index: 4, kind: input, shape index: {}]   ;;  %s1677_s6 = inlined_call_operand.vmem [shape: f32[4,8,1], index: 6, kind: input, shape index: {}]   ;;  %s1678_s3 = inlined_call_operand.vmem [shape: bf16[4,32,32], index: 3, kind: input, shape index: {}]   ;;  %s1679_s5 = inlined_call_operand.vmem [shape: bf16[4,8,32], index: 5, kind: input, shape index: {}]   ;;  %s1680_s8 = inlined_call_operand.vmem [shape: f32[4,128], index: 8, kind: output, shape index: {1}]   ;;  %s1681_s7 = inlined_call_operand.vmem [shape: f32[8,128], index: 7, kind: output, shape index: {0}]  }
   0x1   :  { %v1423_v0 = vld [vmem:[%s1673_s0] sm:$0xff]  ;;  %1338 = vset.pattern.permute.xlu0 %v1372_v1  ;;  %1339 = vset.pattern.permute.xlu1 %v1372_v1  ;;  %v37_v5 = vld [vmem:[%s1675_s2 + $0x10] sm:$0xff]  ;;  %v1341_v7 = vld [vmem:[%s1674_s1 + $0x8] sm:$0xff]   ;;  %v1373_v62 = vmov 0.0   ;;  %vm1374_vm3 = vmmov 0   ;;  %vm1101_vm4 = vcmask 1043456  }
   0x2   :  { %v34_v2 = vpack.c.bf16 %v1423_v0, %v1423_v0  ;;  %v1340_v3 = vld [vmem:[%s1674_s1] sm:$0xff]   ;;  %51 = vperm.xlu1 %1339, %v37_v5   ;;  %v36_v8 = vld [vmem:[%s1675_s2 + $0x8] sm:$0xff]  ;;  %v38_v9 = vld [vmem:[%s1675_s2 + $0x18] sm:$0xff] }
   0x3   :  { %v35_v4 = vld [vmem:[%s1675_s2] sm:$0xff]  ;;  %1245 = vmatprep.mubr.msk.bf16.mxu0 %vm69_vm1, %v1340_v3  ;;  %v140_v11 = vld [vmem:[%s1676_s4 + $0x8] sm:$0xff]  ;;  %v141_v12 = vld [vmem:[%s1676_s4 + $0x10] sm:$0xff] }
   0x4   :  { %1331 = vmatprep.subr.msk.bf16.mxu0 %vm76_vm0, %v34_v2  ;;  %v78_v6 = vsel %vm76_vm0, %v34_v2, 0  ;;  %41 = vperm.xlu0 %1338, %v35_v4   ;;  %v139_v10 = vld [vmem:[%s1676_s4] sm:$0xff]  ;;  %v142_v13 = vld [vmem:[%s1676_s4 + $0x18] sm:$0xff]  ;;  %v1127_v16 = vld [vmem:[%s1675_s2 + $0x28] sm:$0xff] }
   0x5   :  { %1244 = vmatpush3.bf16.msra.mxu0 %v78_v6  ;;  %v236_v14 = vld [vmem:[%s1677_s6] sm:$0xff]  ;;  %v1128_v17 = vld [vmem:[%s1675_s2 + $0x30] sm:$0xff]  ;;  %v1129_v18 = vld [vmem:[%s1675_s2 + $0x38] sm:$0xff] }
   0x6   :  { %56 = vperm.xlu1 %1339, %v38_v9   ;;  %v1126_v15 = vld [vmem:[%s1675_s2 + $0x20] sm:$0xff]  ;;  %v1139_v20 = vld [vmem:[%s1676_s4 + $0x28] sm:$0xff]  ;;  %v1140_v21 = vld [vmem:[%s1676_s4 + $0x30] sm:$0xff]  ;;  %1257 = vmatprep.subr.bf16.mxu0 %v1373_v62 }
   0x7   :  { %v1138_v19 = vld [vmem:[%s1676_s4 + $0x20] sm:$0xff]  ;;  %v1141_v22 = vld [vmem:[%s1676_s4 + $0x38] sm:$0xff]  ;;  %v1147_v23 = vld [vmem:[%s1677_s6 + $0x8] sm:$0xff] }
   0x8   :  { %1246 = vmatmul.mubr.msk.bf16.vlgmr.msra.gmra.mrb[0].mxu0 %vm69_vm1, %v1341_v7  ;;  %46 = vperm.xlu0 %1338, %v36_v8   ;;  %v1153_v24 = vld [vmem:[%s1675_s2 + $0x40] sm:$0xff]  ;;  %v1154_v25 = vld [vmem:[%s1675_s2 + $0x48] sm:$0xff]  ;;  %v1155_v26 = vld [vmem:[%s1675_s2 + $0x50] sm:$0xff] }
   0x9   :  { %v1156_v27 = vld [vmem:[%s1675_s2 + $0x58] sm:$0xff]  ;;  %v1165_v28 = vld [vmem:[%s1676_s4 + $0x40] sm:$0xff]  ;;  %v1166_v29 = vld [vmem:[%s1676_s4 + $0x48] sm:$0xff]  ;;  %1261 = vmatprep.mubr.msk.bf16.mxu0 %vm1374_vm3, %v1373_v62 }
   0xa   :  { %150 = vperm.xlu1 %1339, %v140_v11   ;;  %v1167_v30 = vld [vmem:[%s1676_s4 + $0x50] sm:$0xff]  ;;  %v1168_v31 = vld [vmem:[%s1676_s4 + $0x58] sm:$0xff]  ;;  %v1180_v33 = vld [vmem:[%s1675_s2 + $0x60] sm:$0xff] }
   0xb   :  { %v1174_v32 = vld [vmem:[%s1677_s6 + $0x10] sm:$0xff]  ;;  %v1181_v34 = vld [vmem:[%s1675_s2 + $0x68] sm:$0xff]  ;;  %v1183_v36 = vld [vmem:[%s1675_s2 + $0x78] sm:$0xff] }
   0xc   :  { %145 = vperm.xlu0 %1338, %v139_v10   ;;  %v1182_v35 = vld [vmem:[%s1675_s2 + $0x70] sm:$0xff]  ;;  %v1192_v37 = vld [vmem:[%s1676_s4 + $0x60] sm:$0xff]  ;;  %v1193_v38 = vld [vmem:[%s1676_s4 + $0x68] sm:$0xff] }
   0xd   :  { %v1194_v39 = vld [vmem:[%s1676_s4 + $0x70] sm:$0xff]  ;;  %v1195_v40 = vld [vmem:[%s1676_s4 + $0x78] sm:$0xff]  ;;  %v1342_v42 = vld [vmem:[%s1678_s3] sm:$0xff]  }
   0xe   :  { %160 = vperm.xlu1 %1339, %v142_v13   ;;  %v1201_v41 = vld [vmem:[%s1677_s6 + $0x18] sm:$0xff]  ;;  %1253 = vmatprep.mubr.msk.bf16.mxu1 %vm173_vm2, %v1342_v42  ;;  %v1343_v61 = vld [vmem:[%s1678_s3 + $0x8] sm:$0xff]  }
  0x10   :  { %155 = vperm.xlu0 %1338, %v141_v12  }
  0x12   :  { %310 = vperm.xlu1 %1339, %v1126_v15  }
  0x14   :  { %239 = vperm.xlu0 %1338, %v236_v14  }
  0x16   :  { %320 = vperm.xlu1 %1339, %v1128_v17  }
  0x18   :  { %315 = vperm.xlu0 %1338, %v1127_v16  }
  0x1a   :  { %414 = vperm.xlu1 %1339, %v1138_v19   ;;  %v1344_v19 = vld [vmem:[%s1674_s1 + $0x10] sm:$0xff]  }
  0x1c   :  { %325 = vperm.xlu0 %1338, %v1129_v18   ;;  %v233_v18 = vld [vmem:[%s1679_s5] sm:$0xf] }
  0x1e   :  { %424 = vperm.xlu1 %1339, %v1140_v21  }
  0x20   :  { %419 = vperm.xlu0 %1338, %v1139_v20  }
  0x22   :  { %509 = vperm.xlu1 %1339, %v1147_v23  }
  0x24   :  { %429 = vperm.xlu0 %1338, %v1141_v22  }
  0x26   :  { %582 = vperm.xlu1 %1339, %v1154_v25  }
  0x28   :  { %577 = vperm.xlu0 %1338, %v1153_v24  }
  0x2a   :  { %592 = vperm.xlu1 %1339, %v1156_v27  }
  0x2c   :  { %587 = vperm.xlu0 %1338, %v1155_v26  }
  0x2e   :  { %686 = vperm.xlu1 %1339, %v1166_v29  }
  0x30   :  { %681 = vperm.xlu0 %1338, %v1165_v28   ;;  %v289_v28 = vrot.slane %v1423_v0, 4 }
  0x32   :  { %696 = vperm.xlu1 %1339, %v1168_v31  }
  0x34   :  { %691 = vperm.xlu0 %1338, %v1167_v30  }
  0x36   :  { %844 = vperm.xlu1 %1339, %v1180_v33  }
  0x38   :  { %776 = vperm.xlu0 %1338, %v1174_v32  }
  0x3a   :  { %854 = vperm.xlu1 %1339, %v1182_v35   ;;  %v1345_v35 = vld [vmem:[%s1674_s1 + $0x18] sm:$0xff]  }
  0x3c   :  { %849 = vperm.xlu0 %1338, %v1181_v34  }
  0x3e   :  { %948 = vperm.xlu1 %1339, %v1192_v37  }
  0x40   :  { %859 = vperm.xlu0 %1338, %v1183_v36   ;;  %v1346_v36 = vld [vmem:[%s1678_s3 + $0x10] sm:$0xff]  }
  0x42   :  { %958 = vperm.xlu1 %1339, %v1194_v39  }
  0x44   :  { %953 = vperm.xlu0 %1338, %v1193_v38  }
  0x46   :  { %1043 = vperm.xlu1 %1339, %v1201_v41  }
  0x48   :  { %963 = vperm.xlu0 %1338, %v1195_v40  }
  0x81   :  { %v52_v43 = vpop.permute.xlu1 %51 }
  0x83   :  { %v42_v44 = vpop.permute.xlu0 %41 }
  0x85   :  { %v57_v48 = vpop.permute.xlu1 %56 }
  0x87   :  { %v47_v51 = vpop.permute.xlu0 %46 }
  0x89   :  { %v151_v1 = vpop.permute.xlu1 %150 }
  0x8b   :  { %v146_v63 = vpop.permute.xlu0 %145 }
  0x8d   :  { %v161_v6 = vpop.permute.xlu1 %160 }
  0x8f   :  { %v156_v2 = vpop.permute.xlu0 %155 }
  0x91   :  { %v311_v37 = vpop.permute.xlu1 %310 }
  0x93   :  { %v240_v20 = vpop.permute.xlu0 %239 }
  0x95   :  { %v321_v39 = vpop.permute.xlu1 %320 }
  0x97   :  { %v316_v38 = vpop.permute.xlu0 %315 }
  0xdb   :  { %v1247_v45 = vpop.f32.mrb[0].mxu0 }
  0xdc   :  { %v123_v46 = vadd.f32 %v1247_v45, %v52_v43  ;;  %v114_v47 = vpop.f32.mrb[1].mxu0  ;;  %v326_v43 = vpop.permute.xlu0 %325 }
  0xdd   :  { %v115_v49 = vadd.f32 %v114_v47, %v42_v44  ;;  %v1248_v50 = vpop.f32.mrb[2].mxu0 }
  0xde   :  { %v126_v52 = vadd.f32 %v1248_v50, %v57_v48  ;;  %v117_v53 = vpop.f32.mrb[3].mxu0  ;;  %v131_v55 = vmax.f32 %v123_v46, 0.0 }
  0xdf   :  { %v118_v54 = vadd.f32 %v117_v53, %v47_v51  ;;  %v129_v57 = vmax.f32 %v115_v49, 0.0 }
  0xe0   :  { %v132_v56 = vmax.f32 %v126_v52, 0.0 }
  0xe1   :  { %v130_v58 = vmax.f32 %v118_v54, 0.0 }
  0xe2   :  { %v138_v59 = vpack.c.bf16 %v132_v56, %v131_v55  ;;  %v1347_v55 = vld [vmem:[%s1678_s3 + $0x18] sm:$0xff]   ;;  %v415_v56 = vpop.permute.xlu1 %414 }
  0xe3   :  { %v137_v60 = vpack.c.bf16 %v130_v58, %v129_v57  ;;  %v420_v57 = vpop.permute.xlu0 %419 }
  0xe5   :  { %1249 = vmatprep.subr.bf16.mxu1 %v137_v60 }
  0xe6   :  { %1250 = vmatpush3.bf16.msra.mxu1 %v137_v60  ;;  %v425_v58 = vpop.permute.xlu1 %424 }
  0xe7   :  { %1251 = vmatprep.subr.bf16.mxu1 %v138_v59 }
  0xea   :  { %1252 = vmatpush3.bf16.msra.mxu1 %v138_v59 }
  0xed   :  { %1254 = vmatmul.mubr.msk.bf16.vlgmr.msra.gmra.mrb[0].mxu1 %vm173_vm2, %v1343_v61 }
  0xee   :  { %1267 = vmatprep.mubr.msk.bf16.mxu1 %vm69_vm1, %v1344_v19 }
 0x1c0   :  { %v1255_v3 = vpop.f32.mrb[0].mxu1 }
 0x1c1   :  { %v223_v4 = vadd.f32 %v1255_v3, %v156_v2  ;;  %v214_v5 = vpop.f32.mrb[1].mxu1 }
 0x1c2   :  { %v215_v7 = vadd.f32 %v214_v5, %v146_v63  ;;  %v1256_v8 = vpop.f32.mrb[2].mxu1  ;;  %v430_v63 = vpop.permute.xlu0 %429 }
 0x1c3   :  { %v226_v9 = vadd.f32 %v1256_v8, %v161_v6  ;;  %v217_v10 = vpop.f32.mrb[3].mxu1  ;;  %v231_v12 = vmax.f32 %v223_v4, 0.0 }
 0x1c4   :  { %v218_v11 = vadd.f32 %v217_v10, %v151_v1  ;;  %v229_v14 = vmax.f32 %v215_v7, 0.0 }
 0x1c5   :  { %v232_v13 = vmax.f32 %v226_v9, 0.0 }
 0x1c6   :  { %v230_v15 = vmax.f32 %v218_v11, 0.0 }
 0x1c7   :  { %v235_v16 = vpack.c.bf16 %v232_v13, %v231_v12  ;;  %v1146_v12 = vld [vmem:[%s1679_s5 + $0x4] sm:$0xf] }
 0x1c8   :  { %v234_v17 = vpack.c.bf16 %v230_v15, %v229_v14  ;;  %v1348_v13 = vld [vmem:[%s1674_s1 + $0x20] sm:$0xff]   ;;  %v510_v14 = vpop.permute.xlu1 %509 }
 0x1ca   :  { %1258 = vmatpush3.bf16.msra.mxu0 %v234_v17 }
 0x1cb   :  { %1259 = vmatprep.subr.bf16.mxu0 %v1373_v62 }
 0x1ce   :  { %1260 = vmatpush3.bf16.msra.mxu0 %v235_v16 }
 0x1d1   :  { %1262 = vmatmul.mubr.msk.bf16.vlgmr.msra.gmra.mrb[4].mxu0 %vm173_vm2, %v233_v18 }
 0x1d2   :  { %1275 = vmatprep.mubr.msk.bf16.mxu0 %vm173_vm2, %v1346_v36 }
 0x2a4   :  { %v279_v21 = vpop.f32.mrb[4].mxu0 }
 0x2a5   :  { %v280_v22 = vadd.f32 %v279_v21, %v240_v20  ;;  %v1263_v23 = vpop.f32.mrb[5].mxu0 }
 0x2a6   :  { %v282_v24 = vpop.f32.mrb[6].mxu0 }
 0x2a7   :  { %1356 = vtanh.f32 %v280_v22  ;;  %v1264_v25 = vpop.f32.mrb[7].mxu0  ;;  %v293_v31 = vrot.slane %v280_v22, 4 }
 0x2b1   :  { %v1565_v26 = vpop.eup %1356 }
 0x2b2   :  { %v286_v27 = vmul.f32 1.442695, %v1565_v26 }
 0x2b4   :  { %1358 = vpow2.f32 %v286_v27 }
 0x2be   :  { %v1359_v29 = vpop.eup %1358 }
 0x2bf   :  { %v291_v30 = vmul.f32 %v1359_v29, %v289_v28  ;;  %v1349_v29 = vld [vmem:[%s1674_s1 + $0x28] sm:$0xff]  }
 0x2c1   :  { %v1569_v32 = vadd.f32 %v293_v31, %v291_v30  ;;  %v578_v30 = vpop.permute.xlu0 %577  ;;  %v583_v31 = vpop.permute.xlu1 %582 }
 0x2c3   :  { %v302_v33 = vpack.c.bf16 %v1569_v32, %v1569_v32 }
 0x2c5   :  { %1332 = vmatprep.subr.msk.bf16.mxu1 %vm76_vm0, %v302_v33  ;;  %v345_v34 = vsel %vm76_vm0, %v302_v33, 0  ;;  %v588_v33 = vpop.permute.xlu0 %587 }
 0x2c6   :  { %1266 = vmatpush3.bf16.msra.mxu1 %v345_v34 }
 0x2c7   :  { %1279 = vmatprep.subr.bf16.mxu1 %v1373_v62 }
 0x2c9   :  { %1268 = vmatmul.mubr.msk.bf16.vlgmr.msra.gmra.mrb[4].mxu1 %vm69_vm1, %v1345_v35 }
 0x2ca   :  { %1283 = vmatprep.mubr.msk.bf16.mxu1 %vm1374_vm3, %v1373_v62 }
 0x39c   :  { %v1269_v40 = vpop.f32.mrb[4].mxu1 }
 0x39d   :  { %v390_v41 = vadd.f32 %v1269_v40, %v321_v39  ;;  %v381_v42 = vpop.f32.mrb[5].mxu1 }
 0x39e   :  { %v382_v44 = vadd.f32 %v381_v42, %v311_v37  ;;  %v1270_v45 = vpop.f32.mrb[6].mxu1  ;;  %v593_v37 = vpop.permute.xlu1 %592 }
 0x39f   :  { %v393_v46 = vadd.f32 %v1270_v45, %v326_v43  ;;  %v384_v47 = vpop.f32.mrb[7].mxu1  ;;  %v398_v49 = vmax.f32 %v390_v41, 0.0 }
 0x3a0   :  { %v385_v48 = vadd.f32 %v384_v47, %v316_v38  ;;  %v396_v51 = vmax.f32 %v382_v44, 0.0 }
 0x3a1   :  { %v399_v50 = vmax.f32 %v393_v46, 0.0 }
 0x3a2   :  { %v397_v52 = vmax.f32 %v385_v48, 0.0 }
 0x3a3   :  { %v406_v53 = vpack.c.bf16 %v399_v50, %v398_v49  ;;  %v1351_v49 = vld [vmem:[%s1678_s3 + $0x28] sm:$0xff]   ;;  %v682_v50 = vpop.permute.xlu0 %681 }
 0x3a4   :  { %v405_v54 = vpack.c.bf16 %v397_v52, %v396_v51  ;;  %v687_v51 = vpop.permute.xlu1 %686 }
 0x3a6   :  { %1271 = vmatprep.subr.bf16.mxu0 %v405_v54 }
 0x3a7   :  { %1272 = vmatpush3.bf16.msra.mxu0 %v405_v54  ;;  %v692_v52 = vpop.permute.xlu0 %691 }
 0x3a8   :  { %1273 = vmatprep.subr.bf16.mxu0 %v406_v53 }
 0x3ab   :  { %1274 = vmatpush3.bf16.msra.mxu0 %v406_v53 }
 0x3ae   :  { %1276 = vmatmul.mubr.msk.bf16.vlgmr.msra.gmra.mrb[8].mxu0 %vm173_vm2, %v1347_v55 }
 0x3af   :  { %1289 = vmatprep.mubr.msk.bf16.mxu0 %vm69_vm1, %v1348_v13 }
 0x481   :  { %v1277_v59 = vpop.f32.mrb[8].mxu0 }
 0x482   :  { %v491_v60 = vadd.f32 %v1277_v59, %v425_v58  ;;  %v482_v61 = vpop.f32.mrb[9].mxu0 }
 0x483   :  { %v483_v1 = vadd.f32 %v482_v61, %v415_v56  ;;  %v1278_v2 = vpop.f32.mrb[10].mxu0  ;;  %v697_v56 = vpop.permute.xlu1 %696 }
 0x484   :  { %v494_v3 = vadd.f32 %v1278_v2, %v430_v63  ;;  %v485_v4 = vpop.f32.mrb[11].mxu0  ;;  %v499_v6 = vmax.f32 %v491_v60, 0.0 }
 0x485   :  { %v486_v5 = vadd.f32 %v485_v4, %v420_v57  ;;  %v497_v8 = vmax.f32 %v483_v1, 0.0 }
 0x486   :  { %v500_v7 = vmax.f32 %v494_v3, 0.0 }
 0x487   :  { %v498_v9 = vmax.f32 %v486_v5, 0.0 }
 0x488   :  { %v504_v10 = vpack.c.bf16 %v500_v7, %v499_v6  ;;  %v1173_v6 = vld [vmem:[%s1679_s5 + $0x8] sm:$0xf]  ;;  %v1352_v7 = vld [vmem:[%s1674_s1 + $0x30] sm:$0xff]  }
 0x489   :  { %v503_v11 = vpack.c.bf16 %v498_v9, %v497_v8  ;;  %v777_v8 = vpop.permute.xlu0 %776 }
 0x48b   :  { %1280 = vmatpush3.bf16.msra.mxu1 %v503_v11 }
 0x48c   :  { %1281 = vmatprep.subr.bf16.mxu1 %v1373_v62 }
 0x48f   :  { %1282 = vmatpush3.bf16.msra.mxu1 %v504_v10 }
 0x492   :  { %1284 = vmatmul.mubr.msk.bf16.vlgmr.msra.gmra.mrb[8].mxu1 %vm173_vm2, %v1146_v12 }
 0x565   :  { %v549_v15 = vpop.f32.mrb[8].mxu1 }
 0x566   :  { %v550_v16 = vadd.f32 %v549_v15, %v510_v14  ;;  %v1285_v17 = vpop.f32.mrb[9].mxu1 }
 0x567   :  { %v552_v18 = vpop.f32.mrb[10].mxu1 }
 0x568   :  { %1360 = vtanh.f32 %v550_v16  ;;  %v1286_v19 = vpop.f32.mrb[11].mxu1  ;;  %v560_v24 = vrot.slane %v550_v16, 4 }
 0x572   :  { %v1599_v20 = vpop.eup %1360 }
 0x573   :  { %v556_v21 = vmul.f32 1.442695, %v1599_v20  ;;  %v563_v14 = vadd.f32 %v1599_v20, %v1565_v26  ;;  %v1353_v26 = vld [vmem:[%s1674_s1 + $0x38] sm:$0xff]   ;;  %v845_v20 = vpop.permute.xlu1 %844 }
 0x575   :  { %1362 = vpow2.f32 %v556_v21 }
 0x57f   :  { %v1363_v22 = vpop.eup %1362 }
 0x580   :  { %v558_v23 = vmul.f32 %v1363_v22, %v1423_v0  ;;  %v1350_v0 = vld [vmem:[%s1678_s3 + $0x20] sm:$0xff]  }
 0x581   :  { %1297 = vmatprep.mubr.msk.bf16.mxu1 %vm173_vm2, %v1350_v0 }
 0x582   :  { %v1603_v25 = vadd.f32 %v560_v24, %v558_v23 }
 0x584   :  { %v569_v27 = vpack.c.bf16 %v1603_v25, %v1603_v25 }
 0x586   :  { %1333 = vmatprep.subr.msk.bf16.mxu0 %vm76_vm0, %v569_v27  ;;  %v612_v28 = vsel %vm76_vm0, %v569_v27, 0  ;;  %v850_v27 = vpop.permute.xlu0 %849 }
 0x587   :  { %1288 = vmatpush3.bf16.msra.mxu0 %v612_v28  ;;  %v855_v28 = vpop.permute.xlu1 %854 }
 0x588   :  { %1301 = vmatprep.subr.bf16.mxu0 %v1373_v62 }
 0x58a   :  { %1290 = vmatmul.mubr.msk.bf16.vlgmr.msra.gmra.mrb[12].mxu0 %vm69_vm1, %v1349_v29 }
 0x58b   :  { %1305 = vmatprep.mubr.msk.bf16.mxu0 %vm1374_vm3, %v1373_v62 }
 0x65d   :  { %v1291_v34 = vpop.f32.mrb[12].mxu0 }
 0x65e   :  { %v657_v35 = vadd.f32 %v1291_v34, %v588_v33  ;;  %v648_v36 = vpop.f32.mrb[13].mxu0 }
 0x65f   :  { %v649_v38 = vadd.f32 %v648_v36, %v578_v30  ;;  %v1292_v39 = vpop.f32.mrb[14].mxu0 }
 0x660   :  { %v660_v40 = vadd.f32 %v1292_v39, %v593_v37  ;;  %v651_v41 = vpop.f32.mrb[15].mxu0  ;;  %v665_v43 = vmax.f32 %v657_v35, 0.0 }
 0x661   :  { %v652_v42 = vadd.f32 %v651_v41, %v583_v31  ;;  %v663_v45 = vmax.f32 %v649_v38, 0.0  ;;  %v860_v31 = vpop.permute.xlu0 %859 }
 0x662   :  { %v666_v44 = vmax.f32 %v660_v40, 0.0 }
 0x663   :  { %v664_v46 = vmax.f32 %v652_v42, 0.0 }
 0x664   :  { %v673_v47 = vpack.c.bf16 %v666_v44, %v665_v43  ;;  %v1355_v44 = vld [vmem:[%s1678_s3 + $0x38] sm:$0xff]  }
 0x665   :  { %v672_v48 = vpack.c.bf16 %v664_v46, %v663_v45  ;;  %v949_v45 = vpop.permute.xlu1 %948  ;;  %v954_v46 = vpop.permute.xlu0 %953 }
 0x667   :  { %1293 = vmatprep.subr.bf16.mxu1 %v672_v48 }
 0x668   :  { %1294 = vmatpush3.bf16.msra.mxu1 %v672_v48 }
 0x669   :  { %1295 = vmatprep.subr.bf16.mxu1 %v673_v47 }
 0x66c   :  { %1296 = vmatpush3.bf16.msra.mxu1 %v673_v47  ;;  %v959_v47 = vpop.permute.xlu1 %958 }
 0x66f   :  { %1298 = vmatmul.mubr.msk.bf16.vlgmr.msra.gmra.mrb[12].mxu1 %vm173_vm2, %v1351_v49 }
 0x670   :  { %1311 = vmatprep.mubr.msk.bf16.mxu1 %vm69_vm1, %v1352_v7 }
 0x742   :  { %v1299_v53 = vpop.f32.mrb[12].mxu1 }
 0x743   :  { %v758_v54 = vadd.f32 %v1299_v53, %v692_v52  ;;  %v749_v55 = vpop.f32.mrb[13].mxu1 }
 0x744   :  { %v750_v57 = vadd.f32 %v749_v55, %v682_v50  ;;  %v1300_v58 = vpop.f32.mrb[14].mxu1 }
 0x745   :  { %v761_v59 = vadd.f32 %v1300_v58, %v697_v56  ;;  %v752_v60 = vpop.f32.mrb[15].mxu1  ;;  %v766_v63 = vmax.f32 %v758_v54, 0.0 }
 0x746   :  { %v753_v61 = vadd.f32 %v752_v60, %v687_v51  ;;  %v764_v2 = vmax.f32 %v750_v57, 0.0  ;;  %v964_v51 = vpop.permute.xlu0 %963 }
 0x747   :  { %v767_v1 = vmax.f32 %v761_v59, 0.0 }
 0x748   :  { %v765_v3 = vmax.f32 %v753_v61, 0.0 }
 0x749   :  { %v771_v4 = vpack.c.bf16 %v767_v1, %v766_v63  ;;  %v1200_v1 = vld [vmem:[%s1679_s5 + $0xc] sm:$0xf] }
 0x74a   :  { %v770_v5 = vpack.c.bf16 %v765_v3, %v764_v2  ;;  %v1044_v2 = vpop.permute.xlu1 %1043 }
 0x74c   :  { %1302 = vmatpush3.bf16.msra.mxu0 %v770_v5 }
 0x74d   :  { %1303 = vmatprep.subr.bf16.mxu0 %v1373_v62 }
 0x750   :  { %1304 = vmatpush3.bf16.msra.mxu0 %v771_v4 }
 0x753   :  { %1306 = vmatmul.mubr.msk.bf16.vlgmr.msra.gmra.mrb[16].mxu0 %vm173_vm2, %v1173_v6 }
 0x826   :  { %v816_v9 = vpop.f32.mrb[16].mxu0 }
 0x827   :  { %v817_v10 = vadd.f32 %v816_v9, %v777_v8  ;;  %v1307_v11 = vpop.f32.mrb[17].mxu0 }
 0x828   :  { %v819_v12 = vpop.f32.mrb[18].mxu0 }
 0x829   :  { %1364 = vtanh.f32 %v817_v10  ;;  %v1308_v13 = vpop.f32.mrb[19].mxu0  ;;  %v827_v21 = vrot.slane %v817_v10, 4 }
 0x833   :  { %v1365_v15 = vpop.eup %1364 }
 0x834   :  { %v823_v16 = vmul.f32 1.442695, %v1365_v15  ;;  %v1635_v17 = vadd.f32 %v1365_v15, %v563_v14 }
 0x836   :  { %1366 = vpow2.f32 %v823_v16 }
 0x840   :  { %v1367_v18 = vpop.eup %1366 }
 0x841   :  { %v825_v19 = vmul.f32 %v1367_v18, %v1569_v32  ;;  %v1354_v32 = vld [vmem:[%s1678_s3 + $0x30] sm:$0xff]  }
 0x842   :  { %1319 = vmatprep.mubr.msk.bf16.mxu0 %vm173_vm2, %v1354_v32 }
 0x843   :  { %v1638_v22 = vadd.f32 %v827_v21, %v825_v19 }
 0x845   :  { %v836_v23 = vpack.c.bf16 %v1638_v22, %v1638_v22  ;;  %v1099_v13 = vrot.slane %v1638_v22, 4 }
 0x847   :  { %1334 = vmatprep.subr.msk.bf16.mxu1 %vm76_vm0, %v836_v23  ;;  %v879_v24 = vsel %vm76_vm0, %v836_v23, 0 }
 0x848   :  { %1310 = vmatpush3.bf16.msra.mxu1 %v879_v24 }
 0x849   :  { %1323 = vmatprep.subr.bf16.mxu1 %v1373_v62 }
 0x84b   :  { %1312 = vmatmul.mubr.msk.bf16.vlgmr.msra.gmra.mrb[16].mxu1 %vm69_vm1, %v1353_v26 }
 0x84c   :  { %1327 = vmatprep.mubr.msk.bf16.mxu1 %vm1374_vm3, %v1373_v62 }
 0x91e   :  { %v1313_v29 = vpop.f32.mrb[16].mxu1 }
 0x91f   :  { %v924_v0 = vadd.f32 %v1313_v29, %v855_v28  ;;  %v915_v30 = vpop.f32.mrb[17].mxu1 }
 0x920   :  { %v916_v33 = vadd.f32 %v915_v30, %v845_v20  ;;  %v1314_v34 = vpop.f32.mrb[18].mxu1 }
 0x921   :  { %v927_v35 = vadd.f32 %v1314_v34, %v860_v31  ;;  %v918_v36 = vpop.f32.mrb[19].mxu1  ;;  %v932_v38 = vmax.f32 %v924_v0, 0.0 }
 0x922   :  { %v919_v37 = vadd.f32 %v918_v36, %v850_v27  ;;  %v930_v40 = vmax.f32 %v916_v33, 0.0 }
 0x923   :  { %v933_v39 = vmax.f32 %v927_v35, 0.0 }
 0x924   :  { %v931_v41 = vmax.f32 %v919_v37, 0.0 }
 0x925   :  { %v940_v42 = vpack.c.bf16 %v933_v39, %v932_v38 }
 0x926   :  { %v939_v43 = vpack.c.bf16 %v931_v41, %v930_v40 }
 0x928   :  { %1315 = vmatprep.subr.bf16.mxu0 %v939_v43 }
 0x929   :  { %1316 = vmatpush3.bf16.msra.mxu0 %v939_v43 }
 0x92a   :  { %1317 = vmatprep.subr.bf16.mxu0 %v940_v42 }
 0x92d   :  { %1318 = vmatpush3.bf16.msra.mxu0 %v940_v42 }
 0x930   :  { %1320 = vmatmul.mubr.msk.bf16.vlgmr.msra.gmra.mrb[20].mxu0 %vm173_vm2, %v1355_v44 }
 0xa03   :  { %v1321_v48 = vpop.f32.mrb[20].mxu0 }
 0xa04   :  { %v1025_v49 = vadd.f32 %v1321_v48, %v959_v47  ;;  %v1016_v50 = vpop.f32.mrb[21].mxu0 }
 0xa05   :  { %v1017_v52 = vadd.f32 %v1016_v50, %v949_v45  ;;  %v1322_v53 = vpop.f32.mrb[22].mxu0 }
 0xa06   :  { %v1028_v54 = vadd.f32 %v1322_v53, %v964_v51  ;;  %v1019_v55 = vpop.f32.mrb[23].mxu0  ;;  %v1033_v57 = vmax.f32 %v1025_v49, 0.0 }
 0xa07   :  { %v1020_v56 = vadd.f32 %v1019_v55, %v954_v46  ;;  %v1031_v59 = vmax.f32 %v1017_v52, 0.0 }
 0xa08   :  { %v1034_v58 = vmax.f32 %v1028_v54, 0.0 }
 0xa09   :  { %v1032_v60 = vmax.f32 %v1020_v56, 0.0 }
 0xa0a   :  { %v1038_v61 = vpack.c.bf16 %v1034_v58, %v1033_v57 }
 0xa0b   :  { %v1037_v63 = vpack.c.bf16 %v1032_v60, %v1031_v59 }
 0xa0d   :  { %1324 = vmatpush3.bf16.msra.mxu1 %v1037_v63 }
 0xa0e   :  { %1325 = vmatprep.subr.bf16.mxu1 %v1373_v62 }
 0xa11   :  { %1326 = vmatpush3.bf16.msra.mxu1 %v1038_v61 }
 0xa14   :  { %1328 = vmatmul.mubr.msk.bf16.vlgmr.msra.gmra.mrb[20].mxu1 %vm173_vm2, %v1200_v1 }
 0xae7   :  { %v1083_v3 = vpop.f32.mrb[20].mxu1 }
 0xae8   :  { %v1084_v4 = vadd.f32 %v1083_v3, %v1044_v2  ;;  %v1329_v5 = vpop.f32.mrb[21].mxu1 }
 0xae9   :  { %v1086_v6 = vpop.f32.mrb[22].mxu1 }
 0xaea   :  { %1368 = vtanh.f32 %v1084_v4  ;;  %v1330_v7 = vpop.f32.mrb[23].mxu1  ;;  %v1094_v12 = vrot.slane %v1084_v4, 4 }
 0xaf4   :  { %v1369_v8 = vpop.eup %1368 }
 0xaf5   :  { %v1090_v9 = vmul.f32 1.442695, %v1369_v8  ;;  %v1097_v10 = vadd.f32 %v1369_v8, %v1635_v17 }
 0xaf7   :  { %1370 = vpow2.f32 %v1090_v9  ;;  %1104 = vst [vmem:[%s1680_s8] sm:$0xf] %v1097_v10 }
 0xb01   :  { %v1371_v62 = vpop.eup %1370 }
 0xb02   :  { %v1092_v11 = vmul.f32 %v1371_v62, %v1603_v25 }
 0xb04   :  { %v1096_v14 = vadd.f32 %v1094_v12, %v1092_v11 }
 0xb06   :  { %v1102_v15 = vsel %vm1101_vm4, %v1096_v14, %v1099_v13 }
 0xb07   :  { %1103 = vst [vmem:[%s1681_s7] sm:$0xff] %v1102_v15 }

</bundles_post_ra>
